<compile_context>
chip_gen: v7x
topology: tpu7x:2x2x1
jax: 0.10.0
libtpu: 0.0.40
codegen_flags: <defaults>
</compile_context>

<pallas_src>
import functools

import jax
import jax.numpy as jnp
from jax.experimental import pallas as pl
from jax.experimental.pallas import tpu as pltpu


_SQRT_2_OVER_PI = 0.7978845608028654
_GELU_C = 0.044715
_INV_SQRT2 = 0.7071067811865476


def _gelu_tanh(x):
    # tanh-approx GELU: routes the transcendental to the EUP slot (VALU relief).
    return 0.5 * x * (1.0 + jnp.tanh(_SQRT_2_OVER_PI * (x + _GELU_C * x * x * x)))


def _gelu_exact(x):
    # torch.nn.GELU() default (exact erf) — used only by the pure-JAX reference.
    return 0.5 * x * (1.0 + jax.lax.erf(x * _INV_SQRT2))


def _layernorm(x, gamma, beta, eps=1e-5):
    mean = jnp.mean(x, axis=-1, keepdims=True)
    var = jnp.mean((x - mean) ** 2, axis=-1, keepdims=True)
    inv = jax.lax.rsqrt(var + eps)
    return (x - mean) * inv * gamma + beta


def _round_up(x, m):
    return ((x + m - 1) // m) * m


def _dec_layer_kernel(
    slab_ref, he_ref,
    w1v_ref, w1e_ref, b1_ref, w2_ref, b2_ref, w3_ref, b3_ref, e_ref,
    g1_ref, be1_ref, win_ref, bin_ref, wout_ref, bout_ref, g2_ref, be2_ref,
    out_ref,
    *, inv_scale, H, K,
):
    f32 = jnp.float32
    bf16 = jnp.bfloat16

    # Packed narrow input slab: [h_V (H) | mask_attend (K) | mask_V (1)], f32.
    slab = slab_ref[...].astype(f32)              # (T, H+K+1)
    hv = slab[:, :H]                              # (T, H)   f32 (residual/LN path)
    ma = slab[:, H:H + K]                         # (T, K)   0/1
    mv = slab[:, H + K:H + K + 1]                 # (T, 1)   0/1

    hv_b = hv.astype(bf16)
    he_b = he_ref[...]                            # (T, K*C_in)  bf16 edge stream

    # --- message MLP, lane-packed over neighbors (K*H lanes), bf16 operands --
    # m1[:, k*H:(k+1)*H] == gelu(W1([h_V, h_E_k]) + b1)   (no concat needed)
    m1 = _gelu_tanh(
        jnp.dot(hv_b, w1v_ref[...], preferred_element_type=f32)
        + jnp.dot(he_b, w1e_ref[...], preferred_element_type=f32)
        + b1_ref[...])
    m2 = _gelu_tanh(
        jnp.dot(m1.astype(bf16), w2_ref[...], preferred_element_type=f32)
        + b2_ref[...])

    # mask_attend expanded to K*H lanes with a tiny (T,K)@(K,K*H) matmul
    # (0/1 values are exact in bf16).
    ma_exp = jnp.dot(ma.astype(bf16), e_ref[...], preferred_element_type=f32)
    masked = (ma_exp * m2).astype(bf16)           # (T, K*H)

    # W3 commuted with the masked neighbor sum:
    #   dh = (sum_k ma_k * m2_k) @ W3 / scale + (sum_k ma_k) * b3 / scale
    dh = (jnp.dot(masked, w3_ref[...], preferred_element_type=f32)
          + jnp.sum(ma, axis=-1, keepdims=True) * b3_ref[...]) * inv_scale

    # residual + LayerNorm1  (dropout == identity in eval mode)
    x = _layernorm(hv + dh, g1_ref[...], be1_ref[...])

    # PositionWiseFeedForward (F = 4H lanes, lane-dense), bf16 operands
    ff = _gelu_tanh(
        jnp.dot(x.astype(bf16), win_ref[...], preferred_element_type=f32)
        + bin_ref[...])
    ff = (jnp.dot(ff.astype(bf16), wout_ref[...], preferred_element_type=f32)
          + bout_ref[...])

    # residual + LayerNorm2 + mask_V
    x = _layernorm(x + ff, g2_ref[...], be2_ref[...])
    out_ref[...] = (mv * x).astype(out_ref.dtype)


def pack_dec_layer_params(params, K):
    """Per-layer constant packing — call ONCE per layer, reuse every step.

    Builds lane-dense / block-diagonal (over K neighbors) weight slabs and
    pre-casts all matmul weights to bf16 (biases / LN params stay f32).
    """
    H = params["W2"].shape[0]
    bf16 = jnp.bfloat16
    f32 = jnp.float32
    W1 = params["W1"]
    W1v, W1e = W1[:H, :], W1[H:, :]
    return {
        "w1v": jnp.tile(W1v, (1, K)).astype(bf16),                       # (H, K*H)
        "w1e": jax.scipy.linalg.block_diag(*([W1e] * K)).astype(bf16),   # (K*C, K*H)
        "b1": jnp.tile(params["b1"], (1, K)).astype(f32),                # (1, K*H)
        "w2": jax.scipy.linalg.block_diag(*([params["W2"]] * K)).astype(bf16),
        "b2": jnp.tile(params["b2"], (1, K)).astype(f32),                # (1, K*H)
        "w3": jnp.concatenate([params["W3"]] * K, axis=0).astype(bf16),  # (K*H, H)
        "b3": params["b3"].astype(f32),                                  # (1, H)
        "e": jnp.kron(jnp.eye(K, dtype=f32),
                      jnp.ones((1, H), f32)).astype(bf16),               # (K, K*H)
        "g1": params["g1"].astype(f32), "be1": params["be1"].astype(f32),
        "win": params["Win"].astype(bf16), "bin": params["bin"].astype(f32),
        "wout": params["Wout"].astype(bf16), "bout": params["bout"].astype(f32),
        "g2": params["g2"].astype(f32), "be2": params["be2"].astype(f32),
    }


def protein_mpnn_dec_layer(h_V, h_E, mask_V, mask_attend, packed, *,
                           scale=30.0, tile=1024):
    B, L, H = h_V.shape
    K, C_in = h_E.shape[2], h_E.shape[3]
    N = B * L

    # Row tile: multiple of 16 (bf16 sublane packing), capped so the grid has
    # at least 2 steps (v7x megacore), within the VMEM budget (~8 MiB/step at
    # tile=1024; raise tile on v6e if desired — vmem_limit_bytes below allows it).
    tile = max(16, min(int(tile), _round_up(max(N // 2, 1), 16)))
    tile = _round_up(tile, 16)
    grid = pl.cdiv(N, tile)   # ragged last block handled by Pallas (no jnp.pad)

    # One packed narrow slab = [h_V | mask_attend | mask_V]  (f32, H+K+1 lanes).
    slab = jnp.concatenate(
        [h_V.reshape(N, H).astype(jnp.float32),
         mask_attend.reshape(N, K).astype(jnp.float32),
         mask_V.reshape(N, 1).astype(jnp.float32)], axis=-1)
    # Lane-dense bf16 edge stream (dominant HBM traffic, halved vs f32).
    he = h_E.reshape(N, K * C_in).astype(jnp.bfloat16)

    weights = [packed[k] for k in
               ("w1v", "w1e", "b1", "w2", "b2", "w3", "b3", "e",
                "g1", "be1", "win", "bin", "wout", "bout", "g2", "be2")]

    row = lambda i: (i, 0)
    full = lambda i: (0, 0)
    weight_specs = [pl.BlockSpec(w.shape, full) for w in weights]

    grid_spec = pltpu.PrefetchScalarGridSpec(
        num_scalar_prefetch=0,
        grid=(grid,),
        in_specs=[
            pl.BlockSpec((tile, H + K + 1), row),     # packed slab
            pl.BlockSpec((tile, K * C_in), row),      # bf16 edges
        ] + weight_specs,
        out_specs=pl.BlockSpec((tile, H), row),
    )

    out = pl.pallas_call(
        functools.partial(_dec_layer_kernel,
                          inv_scale=1.0 / float(scale), H=H, K=K),
        out_shape=jax.ShapeDtypeStruct((N, H), h_V.dtype),
        grid_spec=grid_spec,
        compiler_params=pltpu.CompilerParams(
            dimension_semantics=("parallel",),
            vmem_limit_bytes=32 * 1024 * 1024),
    )(slab, he, *weights)

    return out.reshape(B, L, H)


def _reference(h_V, h_E, mask_V, mask_attend, params, scale=30.0):
    """Pure-JAX reference mirroring the PyTorch forward (eval mode, f32/erf)."""
    B, L, H = h_V.shape
    K = h_E.shape[2]
    hv_exp = jnp.broadcast_to(h_V[:, :, None, :], (B, L, K, H))
    h_ev = jnp.concatenate([hv_exp, h_E], axis=-1)
    m = _gelu_exact(h_ev @ params["W1"] + params["b1"][0])
    m = _gelu_exact(m @ params["W2"] + params["b2"][0])
    m = m @ params["W3"] + params["b3"][0]
    m = mask_attend[..., None] * m
    dh = jnp.sum(m, axis=-2) / scale
    x = _layernorm(h_V + dh, params["g1"][0], params["be1"][0])
    ff = _gelu_exact(x @ params["Win"] + params["bin"][0])
    ff = ff @ params["Wout"] + params["bout"][0]
    x = _layernorm(x + ff, params["g2"][0], params["be2"][0])
    return mask_V[..., None] * x


def init_params(key, num_hidden, num_in):
    H, C = num_hidden, num_in
    F = 4 * H
    ks = jax.random.split(key, 10)
    return {
        # Linear weights stored as (in, out) for x @ W
        "W1": 0.1 * jax.random.normal(ks[0], (H + C, H), jnp.float32),
        "b1": 0.01 * jax.random.normal(ks[1], (1, H), jnp.float32),
        "W2": 0.1 * jax.random.normal(ks[2], (H, H), jnp.float32),
        "b2": 0.01 * jax.random.normal(ks[3], (1, H), jnp.float32),
        "W3": 0.1 * jax.random.normal(ks[4], (H, H), jnp.float32),
        "b3": 0.01 * jax.random.normal(ks[5], (1, H), jnp.float32),
        "g1": jnp.ones((1, H), jnp.float32),
        "be1": jnp.zeros((1, H), jnp.float32),
        "Win": 0.1 * jax.random.normal(ks[6], (H, F), jnp.float32),
        "bin": 0.01 * jax.random.normal(ks[7], (1, F), jnp.float32),
        "Wout": 0.1 * jax.random.normal(ks[8], (F, H), jnp.float32),
        "bout": 0.01 * jax.random.normal(ks[9], (1, H), jnp.float32),
        "g2": jnp.ones((1, H), jnp.float32),
        "be2": jnp.zeros((1, H), jnp.float32),
    }


if __name__ == "__main__":
    num_hidden, num_in, K = 32, 64, 4
    key = jax.random.PRNGKey(0)
    kp, key = jax.random.split(key)
    params = init_params(kp, num_hidden, num_in)
    packed = pack_dec_layer_params(params, K)   # hoisted: packed ONCE per layer

    # Relaxed tolerance: kernel uses bf16 matmul operands + tanh-approx GELU
    # (deliberate perf/accuracy trade-off vs. the f32 / exact-erf reference).
    ATOL = RTOL = 5e-2

    # Small canonical case.
    B, L = 2, 8
    k1, k2, k3, k4, key = jax.random.split(key, 5)
    h_V = jax.random.normal(k1, (B, L, num_hidden), jnp.float32)
    h_E = jax.random.normal(k2, (B, L, K, num_in), jnp.float32)
    mask_attend = (jax.random.uniform(k3, (B, L, K)) > 0.2).astype(jnp.float32)
    mask_V = (jax.random.uniform(k4, (B, L)) > 0.1).astype(jnp.float32)

    layer = jax.jit(functools.partial(protein_mpnn_dec_layer, scale=30.0, tile=1024))
    out = jax.block_until_ready(layer(h_V, h_E, mask_V, mask_attend, packed))
    ref = _reference(h_V, h_E, mask_V, mask_attend, params, scale=30.0)
    assert out.shape == (B, L, num_hidden)
    assert jnp.allclose(out, ref, atol=ATOL, rtol=RTOL)

    # Larger case exercising a multi-step grid + a ragged (non-divisible) last block.
    B2, L2 = 3, 50
    k1, k2, k3, k4, key = jax.random.split(key, 5)
    h_V2 = jax.random.normal(k1, (B2, L2, num_hidden), jnp.float32)
    h_E2 = jax.random.normal(k2, (B2, L2, K, num_in), jnp.float32)
    ma2 = (jax.random.uniform(k3, (B2, L2, K)) > 0.2).astype(jnp.float32)
    mv2 = (jax.random.uniform(k4, (B2, L2)) > 0.1).astype(jnp.float32)

    layer2 = jax.jit(functools.partial(protein_mpnn_dec_layer, scale=30.0, tile=64))
    out2 = jax.block_until_ready(layer2(h_V2, h_E2, mv2, ma2, packed))
    ref2 = _reference(h_V2, h_E2, mv2, ma2, params, scale=30.0)
    assert out2.shape == (B2, L2, num_hidden)
    assert jnp.allclose(out2, ref2, atol=ATOL, rtol=RTOL)

    print("KERNEL_OK")
</pallas_src>

<mosaic_0001>
module attributes {stable_mosaic.version = 11 : i64} {
  func.func @_dec_layer_kernel(%arg0: i32, %arg1: memref<16x37xf32, #tpu.memory_space<vmem>>, %arg2: memref<16x256xbf16, #tpu.memory_space<vmem>>, %arg3: memref<32x128xbf16, #tpu.memory_space<vmem>>, %arg4: memref<256x128xbf16, #tpu.memory_space<vmem>>, %arg5: memref<1x128xf32, #tpu.memory_space<vmem>>, %arg6: memref<128x128xbf16, #tpu.memory_space<vmem>>, %arg7: memref<1x128xf32, #tpu.memory_space<vmem>>, %arg8: memref<128x32xbf16, #tpu.memory_space<vmem>>, %arg9: memref<1x32xf32, #tpu.memory_space<vmem>>, %arg10: memref<4x128xbf16, #tpu.memory_space<vmem>>, %arg11: memref<1x32xf32, #tpu.memory_space<vmem>>, %arg12: memref<1x32xf32, #tpu.memory_space<vmem>>, %arg13: memref<32x128xbf16, #tpu.memory_space<vmem>>, %arg14: memref<1x128xf32, #tpu.memory_space<vmem>>, %arg15: memref<128x32xbf16, #tpu.memory_space<vmem>>, %arg16: memref<1x32xf32, #tpu.memory_space<vmem>>, %arg17: memref<1x32xf32, #tpu.memory_space<vmem>>, %arg18: memref<1x32xf32, #tpu.memory_space<vmem>>, %arg19: memref<16x32xf32, #tpu.memory_space<vmem>>) attributes {dimension_semantics = [#tpu.dimension_semantics<parallel>], iteration_bounds = array<i64: 1>, scalar_prefetch = 0 : i64, scratch_operands = 0 : i64, tpu.core_type = #tpu.core_type<tc>, window_params = [{transform_indices = @transform_0, window_bounds = array<i64: 16, 37>}, {transform_indices = @transform_1, window_bounds = array<i64: 16, 256>}, {pipeline_mode = #tpu.pipeline_mode<synchronous>, transform_indices = @transform_2, window_bounds = array<i64: 32, 128>}, {pipeline_mode = #tpu.pipeline_mode<synchronous>, transform_indices = @transform_3, window_bounds = array<i64: 256, 128>}, {pipeline_mode = #tpu.pipeline_mode<synchronous>, transform_indices = @transform_4, window_bounds = array<i64: 1, 128>}, {pipeline_mode = #tpu.pipeline_mode<synchronous>, transform_indices = @transform_5, window_bounds = array<i64: 128, 128>}, {pipeline_mode = #tpu.pipeline_mode<synchronous>, transform_indices = @transform_6, window_bounds = array<i64: 1, 128>}, {pipeline_mode = #tpu.pipeline_mode<synchronous>, transform_indices = @transform_7, window_bounds = array<i64: 128, 32>}, {pipeline_mode = #tpu.pipeline_mode<synchronous>, transform_indices = @transform_8, window_bounds = array<i64: 1, 32>}, {pipeline_mode = #tpu.pipeline_mode<synchronous>, transform_indices = @transform_9, window_bounds = array<i64: 4, 128>}, {pipeline_mode = #tpu.pipeline_mode<synchronous>, transform_indices = @transform_10, window_bounds = array<i64: 1, 32>}, {pipeline_mode = #tpu.pipeline_mode<synchronous>, transform_indices = @transform_11, window_bounds = array<i64: 1, 32>}, {pipeline_mode = #tpu.pipeline_mode<synchronous>, transform_indices = @transform_12, window_bounds = array<i64: 32, 128>}, {pipeline_mode = #tpu.pipeline_mode<synchronous>, transform_indices = @transform_13, window_bounds = array<i64: 1, 128>}, {pipeline_mode = #tpu.pipeline_mode<synchronous>, transform_indices = @transform_14, window_bounds = array<i64: 128, 32>}, {pipeline_mode = #tpu.pipeline_mode<synchronous>, transform_indices = @transform_15, window_bounds = array<i64: 1, 32>}, {pipeline_mode = #tpu.pipeline_mode<synchronous>, transform_indices = @transform_16, window_bounds = array<i64: 1, 32>}, {pipeline_mode = #tpu.pipeline_mode<synchronous>, transform_indices = @transform_17, window_bounds = array<i64: 1, 32>}, {transform_indices = @transform_18, window_bounds = array<i64: 16, 32>}]} {
    %c0 = arith.constant 0 : index
    %c0_0 = arith.constant 0 : index
    %0 = vector.load %arg1[%c0, %c0_0] : memref<16x37xf32, #tpu.memory_space<vmem>>, vector<16x37xf32>
    %1 = vector.extract_strided_slice %0 {offsets = [0, 0], sizes = [16, 32], strides = [1, 1]} : vector<16x37xf32> to vector<16x32xf32>
    %2 = vector.extract_strided_slice %0 {offsets = [0, 32], sizes = [16, 4], strides = [1, 1]} : vector<16x37xf32> to vector<16x4xf32>
    %3 = vector.extract_strided_slice %0 {offsets = [0, 36], sizes = [16, 1], strides = [1, 1]} : vector<16x37xf32> to vector<16x1xf32>
    %4 = arith.truncf %1 : vector<16x32xf32> to vector<16x32xbf16>
    %c0_1 = arith.constant 0 : index
    %c0_2 = arith.constant 0 : index
    %5 = vector.load %arg2[%c0_1, %c0_2] : memref<16x256xbf16, #tpu.memory_space<vmem>>, vector<16x256xbf16>
    %c0_3 = arith.constant 0 : index
    %c0_4 = arith.constant 0 : index
    %6 = vector.load %arg3[%c0_3, %c0_4] : memref<32x128xbf16, #tpu.memory_space<vmem>>, vector<32x128xbf16>
    %cst = arith.constant dense<0.000000e+00> : vector<16x128xf32>
    %7 = tpu.matmul %4, %6, %cst {dimension_numbers = #tpu.dot_dimension_numbers<[1], [0], [0], [1], [0, 0, 1, 1], [], []>} : vector<16x32xbf16>, vector<32x128xbf16>, vector<16x128xf32> -> vector<16x128xf32>
    %c0_5 = arith.constant 0 : index
    %c0_6 = arith.constant 0 : index
    %8 = vector.load %arg4[%c0_5, %c0_6] : memref<256x128xbf16, #tpu.memory_space<vmem>>, vector<256x128xbf16>
    %cst_7 = arith.constant dense<0.000000e+00> : vector<16x128xf32>
    %9 = tpu.matmul %5, %8, %cst_7 {dimension_numbers = #tpu.dot_dimension_numbers<[1], [0], [0], [1], [0, 0, 1, 1], [], []>} : vector<16x256xbf16>, vector<256x128xbf16>, vector<16x128xf32> -> vector<16x128xf32>
    %10 = arith.addf %7, %9 : vector<16x128xf32>
    %c0_8 = arith.constant 0 : index
    %c0_9 = arith.constant 0 : index
    %11 = vector.load %arg5[%c0_8, %c0_9] : memref<1x128xf32, #tpu.memory_space<vmem>>, vector<1x128xf32>
    %12 = vector.broadcast %11 : vector<1x128xf32> to vector<16x128xf32>
    %13 = arith.addf %10, %12 : vector<16x128xf32>
    %cst_10 = arith.constant 5.000000e-01 : f32
    %14 = vector.broadcast %cst_10 : f32 to vector<16x128xf32>
    %15 = arith.mulf %14, %13 : vector<16x128xf32>
    %cst_11 = arith.constant 4.471500e-02 : f32
    %16 = vector.broadcast %cst_11 : f32 to vector<16x128xf32>
    %17 = arith.mulf %16, %13 : vector<16x128xf32>
    %18 = arith.mulf %17, %13 : vector<16x128xf32>
    %19 = arith.mulf %18, %13 : vector<16x128xf32>
    %20 = arith.addf %13, %19 : vector<16x128xf32>
    %cst_12 = arith.constant 0.797884583 : f32
    %21 = vector.broadcast %cst_12 : f32 to vector<16x128xf32>
    %22 = arith.mulf %21, %20 : vector<16x128xf32>
    %23 = math.tanh %22 : vector<16x128xf32>
    %cst_13 = arith.constant 1.000000e+00 : f32
    %24 = vector.broadcast %cst_13 : f32 to vector<16x128xf32>
    %25 = arith.addf %24, %23 : vector<16x128xf32>
    %26 = arith.mulf %15, %25 : vector<16x128xf32>
    %27 = arith.truncf %26 : vector<16x128xf32> to vector<16x128xbf16>
    %c0_14 = arith.constant 0 : index
    %c0_15 = arith.constant 0 : index
    %28 = vector.load %arg6[%c0_14, %c0_15] : memref<128x128xbf16, #tpu.memory_space<vmem>>, vector<128x128xbf16>
    %cst_16 = arith.constant dense<0.000000e+00> : vector<16x128xf32>
    %29 = tpu.matmul %27, %28, %cst_16 {dimension_numbers = #tpu.dot_dimension_numbers<[1], [0], [0], [1], [0, 0, 1, 1], [], []>} : vector<16x128xbf16>, vector<128x128xbf16>, vector<16x128xf32> -> vector<16x128xf32>
    %c0_17 = arith.constant 0 : index
    %c0_18 = arith.constant 0 : index
    %30 = vector.load %arg7[%c0_17, %c0_18] : memref<1x128xf32, #tpu.memory_space<vmem>>, vector<1x128xf32>
    %31 = vector.broadcast %30 : vector<1x128xf32> to vector<16x128xf32>
    %32 = arith.addf %29, %31 : vector<16x128xf32>
    %cst_19 = arith.constant 5.000000e-01 : f32
    %33 = vector.broadcast %cst_19 : f32 to vector<16x128xf32>
    %34 = arith.mulf %33, %32 : vector<16x128xf32>
    %cst_20 = arith.constant 4.471500e-02 : f32
    %35 = vector.broadcast %cst_20 : f32 to vector<16x128xf32>
    %36 = arith.mulf %35, %32 : vector<16x128xf32>
    %37 = arith.mulf %36, %32 : vector<16x128xf32>
    %38 = arith.mulf %37, %32 : vector<16x128xf32>
    %39 = arith.addf %32, %38 : vector<16x128xf32>
    %cst_21 = arith.constant 0.797884583 : f32
    %40 = vector.broadcast %cst_21 : f32 to vector<16x128xf32>
    %41 = arith.mulf %40, %39 : vector<16x128xf32>
    %42 = math.tanh %41 : vector<16x128xf32>
    %cst_22 = arith.constant 1.000000e+00 : f32
    %43 = vector.broadcast %cst_22 : f32 to vector<16x128xf32>
    %44 = arith.addf %43, %42 : vector<16x128xf32>
    %45 = arith.mulf %34, %44 : vector<16x128xf32>
    %46 = arith.truncf %2 : vector<16x4xf32> to vector<16x4xbf16>
    %c0_23 = arith.constant 0 : index
    %c0_24 = arith.constant 0 : index
    %47 = vector.load %arg10[%c0_23, %c0_24] : memref<4x128xbf16, #tpu.memory_space<vmem>>, vector<4x128xbf16>
    %cst_25 = arith.constant dense<0.000000e+00> : vector<16x128xf32>
    %48 = tpu.matmul %46, %47, %cst_25 {dimension_numbers = #tpu.dot_dimension_numbers<[1], [0], [0], [1], [0, 0, 1, 1], [], []>} : vector<16x4xbf16>, vector<4x128xbf16>, vector<16x128xf32> -> vector<16x128xf32>
    %49 = arith.mulf %48, %45 : vector<16x128xf32>
    %50 = arith.truncf %49 : vector<16x128xf32> to vector<16x128xbf16>
    %c0_26 = arith.constant 0 : index
    %c0_27 = arith.constant 0 : index
    %51 = vector.load %arg8[%c0_26, %c0_27] : memref<128x32xbf16, #tpu.memory_space<vmem>>, vector<128x32xbf16>
    %cst_28 = arith.constant dense<0.000000e+00> : vector<16x32xf32>
    %52 = tpu.matmul %50, %51, %cst_28 {dimension_numbers = #tpu.dot_dimension_numbers<[1], [0], [0], [1], [0, 0, 1, 1], [], []>} : vector<16x128xbf16>, vector<128x32xbf16>, vector<16x32xf32> -> vector<16x32xf32>
    %cst_29 = arith.constant dense<0.000000e+00> : vector<16xf32>
    %53 = vector.multi_reduction <add>, %2, %cst_29 [1] : vector<16x4xf32> to vector<16xf32>
    %54 = vector.shape_cast %53 : vector<16xf32> to vector<16x1xf32>
    %c0_30 = arith.constant 0 : index
    %c0_31 = arith.constant 0 : index
    %55 = vector.load %arg9[%c0_30, %c0_31] : memref<1x32xf32, #tpu.memory_space<vmem>>, vector<1x32xf32>
    %56 = vector.broadcast %54 : vector<16x1xf32> to vector<16x32xf32>
    %57 = vector.broadcast %55 : vector<1x32xf32> to vector<16x32xf32>
    %58 = arith.mulf %56, %57 : vector<16x32xf32>
    %59 = arith.addf %52, %58 : vector<16x32xf32>
    %cst_32 = arith.constant 0.0333333351 : f32
    %60 = vector.broadcast %cst_32 : f32 to vector<16x32xf32>
    %61 = arith.mulf %59, %60 : vector<16x32xf32>
    %62 = arith.addf %1, %61 : vector<16x32xf32>
    %c0_33 = arith.constant 0 : index
    %c0_34 = arith.constant 0 : index
    %63 = vector.load %arg11[%c0_33, %c0_34] : memref<1x32xf32, #tpu.memory_space<vmem>>, vector<1x32xf32>
    %c0_35 = arith.constant 0 : index
    %c0_36 = arith.constant 0 : index
    %64 = vector.load %arg12[%c0_35, %c0_36] : memref<1x32xf32, #tpu.memory_space<vmem>>, vector<1x32xf32>
    %cst_37 = arith.constant dense<0.000000e+00> : vector<16xf32>
    %65 = vector.multi_reduction <add>, %62, %cst_37 [1] : vector<16x32xf32> to vector<16xf32>
    %66 = vector.shape_cast %65 : vector<16xf32> to vector<16x1xf32>
    %cst_38 = arith.constant 3.200000e+01 : f32
    %67 = vector.broadcast %cst_38 : f32 to vector<16x1xf32>
    %68 = arith.divf %66, %67 : vector<16x1xf32>
    %69 = vector.broadcast %68 : vector<16x1xf32> to vector<16x32xf32>
    %70 = arith.subf %62, %69 : vector<16x32xf32>
    %71 = arith.mulf %70, %70 : vector<16x32xf32>
    %cst_39 = arith.constant dense<0.000000e+00> : vector<16xf32>
    %72 = vector.multi_reduction <add>, %71, %cst_39 [1] : vector<16x32xf32> to vector<16xf32>
    %73 = vector.shape_cast %72 : vector<16xf32> to vector<16x1xf32>
    %cst_40 = arith.constant 3.200000e+01 : f32
    %74 = vector.broadcast %cst_40 : f32 to vector<16x1xf32>
    %75 = arith.divf %73, %74 : vector<16x1xf32>
    %cst_41 = arith.constant 9.99999974E-6 : f32
    %76 = vector.broadcast %cst_41 : f32 to vector<16x1xf32>
    %77 = arith.addf %75, %76 : vector<16x1xf32>
    %78 = math.rsqrt %77 : vector<16x1xf32>
    %79 = vector.broadcast %68 : vector<16x1xf32> to vector<16x32xf32>
    %80 = arith.subf %62, %79 : vector<16x32xf32>
    %81 = vector.broadcast %78 : vector<16x1xf32> to vector<16x32xf32>
    %82 = arith.mulf %80, %81 : vector<16x32xf32>
    %83 = vector.broadcast %63 : vector<1x32xf32> to vector<16x32xf32>
    %84 = arith.mulf %82, %83 : vector<16x32xf32>
    %85 = vector.broadcast %64 : vector<1x32xf32> to vector<16x32xf32>
    %86 = arith.addf %84, %85 : vector<16x32xf32>
    %87 = arith.truncf %86 : vector<16x32xf32> to vector<16x32xbf16>
    %c0_42 = arith.constant 0 : index
    %c0_43 = arith.constant 0 : index
    %88 = vector.load %arg13[%c0_42, %c0_43] : memref<32x128xbf16, #tpu.memory_space<vmem>>, vector<32x128xbf16>
    %cst_44 = arith.constant dense<0.000000e+00> : vector<16x128xf32>
    %89 = tpu.matmul %87, %88, %cst_44 {dimension_numbers = #tpu.dot_dimension_numbers<[1], [0], [0], [1], [0, 0, 1, 1], [], []>} : vector<16x32xbf16>, vector<32x128xbf16>, vector<16x128xf32> -> vector<16x128xf32>
    %c0_45 = arith.constant 0 : index
    %c0_46 = arith.constant 0 : index
    %90 = vector.load %arg14[%c0_45, %c0_46] : memref<1x128xf32, #tpu.memory_space<vmem>>, vector<1x128xf32>
    %91 = vector.broadcast %90 : vector<1x128xf32> to vector<16x128xf32>
    %92 = arith.addf %89, %91 : vector<16x128xf32>
    %cst_47 = arith.constant 5.000000e-01 : f32
    %93 = vector.broadcast %cst_47 : f32 to vector<16x128xf32>
    %94 = arith.mulf %93, %92 : vector<16x128xf32>
    %cst_48 = arith.constant 4.471500e-02 : f32
    %95 = vector.broadcast %cst_48 : f32 to vector<16x128xf32>
    %96 = arith.mulf %95, %92 : vector<16x128xf32>
    %97 = arith.mulf %96, %92 : vector<16x128xf32>
    %98 = arith.mulf %97, %92 : vector<16x128xf32>
    %99 = arith.addf %92, %98 : vector<16x128xf32>
    %cst_49 = arith.constant 0.797884583 : f32
    %100 = vector.broadcast %cst_49 : f32 to vector<16x128xf32>
    %101 = arith.mulf %100, %99 : vector<16x128xf32>
    %102 = math.tanh %101 : vector<16x128xf32>
    %cst_50 = arith.constant 1.000000e+00 : f32
    %103 = vector.broadcast %cst_50 : f32 to vector<16x128xf32>
    %104 = arith.addf %103, %102 : vector<16x128xf32>
    %105 = arith.mulf %94, %104 : vector<16x128xf32>
    %106 = arith.truncf %105 : vector<16x128xf32> to vector<16x128xbf16>
    %c0_51 = arith.constant 0 : index
    %c0_52 = arith.constant 0 : index
    %107 = vector.load %arg15[%c0_51, %c0_52] : memref<128x32xbf16, #tpu.memory_space<vmem>>, vector<128x32xbf16>
    %cst_53 = arith.constant dense<0.000000e+00> : vector<16x32xf32>
    %108 = tpu.matmul %106, %107, %cst_53 {dimension_numbers = #tpu.dot_dimension_numbers<[1], [0], [0], [1], [0, 0, 1, 1], [], []>} : vector<16x128xbf16>, vector<128x32xbf16>, vector<16x32xf32> -> vector<16x32xf32>
    %c0_54 = arith.constant 0 : index
    %c0_55 = arith.constant 0 : index
    %109 = vector.load %arg16[%c0_54, %c0_55] : memref<1x32xf32, #tpu.memory_space<vmem>>, vector<1x32xf32>
    %110 = vector.broadcast %109 : vector<1x32xf32> to vector<16x32xf32>
    %111 = arith.addf %108, %110 : vector<16x32xf32>
    %112 = arith.addf %86, %111 : vector<16x32xf32>
    %c0_56 = arith.constant 0 : index
    %c0_57 = arith.constant 0 : index
    %113 = vector.load %arg17[%c0_56, %c0_57] : memref<1x32xf32, #tpu.memory_space<vmem>>, vector<1x32xf32>
    %c0_58 = arith.constant 0 : index
    %c0_59 = arith.constant 0 : index
    %114 = vector.load %arg18[%c0_58, %c0_59] : memref<1x32xf32, #tpu.memory_space<vmem>>, vector<1x32xf32>
    %cst_60 = arith.constant dense<0.000000e+00> : vector<16xf32>
    %115 = vector.multi_reduction <add>, %112, %cst_60 [1] : vector<16x32xf32> to vector<16xf32>
    %116 = vector.shape_cast %115 : vector<16xf32> to vector<16x1xf32>
    %cst_61 = arith.constant 3.200000e+01 : f32
    %117 = vector.broadcast %cst_61 : f32 to vector<16x1xf32>
    %118 = arith.divf %116, %117 : vector<16x1xf32>
    %119 = vector.broadcast %118 : vector<16x1xf32> to vector<16x32xf32>
    %120 = arith.subf %112, %119 : vector<16x32xf32>
    %121 = arith.mulf %120, %120 : vector<16x32xf32>
    %cst_62 = arith.constant dense<0.000000e+00> : vector<16xf32>
    %122 = vector.multi_reduction <add>, %121, %cst_62 [1] : vector<16x32xf32> to vector<16xf32>
    %123 = vector.shape_cast %122 : vector<16xf32> to vector<16x1xf32>
    %cst_63 = arith.constant 3.200000e+01 : f32
    %124 = vector.broadcast %cst_63 : f32 to vector<16x1xf32>
    %125 = arith.divf %123, %124 : vector<16x1xf32>
    %cst_64 = arith.constant 9.99999974E-6 : f32
    %126 = vector.broadcast %cst_64 : f32 to vector<16x1xf32>
    %127 = arith.addf %125, %126 : vector<16x1xf32>
    %128 = math.rsqrt %127 : vector<16x1xf32>
    %129 = vector.broadcast %118 : vector<16x1xf32> to vector<16x32xf32>
    %130 = arith.subf %112, %129 : vector<16x32xf32>
    %131 = vector.broadcast %128 : vector<16x1xf32> to vector<16x32xf32>
    %132 = arith.mulf %130, %131 : vector<16x32xf32>
    %133 = vector.broadcast %113 : vector<1x32xf32> to vector<16x32xf32>
    %134 = arith.mulf %132, %133 : vector<16x32xf32>
    %135 = vector.broadcast %114 : vector<1x32xf32> to vector<16x32xf32>
    %136 = arith.addf %134, %135 : vector<16x32xf32>
    %137 = vector.broadcast %3 : vector<16x1xf32> to vector<16x32xf32>
    %138 = arith.mulf %137, %136 : vector<16x32xf32>
    %c0_65 = arith.constant 0 : index
    %c0_66 = arith.constant 0 : index
    %139 = vector.load %arg19[%c0_65, %c0_66] : memref<16x32xf32, #tpu.memory_space<vmem>>, vector<16x32xf32>
    tpu.vector_store %arg19[%c0_65, %c0_66], %138 {strides = array<i32>} : memref<16x32xf32, #tpu.memory_space<vmem>>, vector<16x32xf32>,
    return
  }
  func.func @transform_0(%arg0: i32) -> (i32, i32) {
    %c0_i32 = arith.constant 0 : i32
    %c0_i32_0 = arith.constant 0 : i32
    return %arg0, %c0_i32 : i32, i32
  }
  func.func @transform_1(%arg0: i32) -> (i32, i32) {
    %c0_i32 = arith.constant 0 : i32
    %c0_i32_0 = arith.constant 0 : i32
    return %arg0, %c0_i32 : i32, i32
  }
  func.func @transform_2(%arg0: i32) -> (i32, i32) {
    %c0_i32 = arith.constant 0 : i32
    %c0_i32_0 = arith.constant 0 : i32
    %c0_i32_1 = arith.constant 0 : i32
    return %c0_i32, %c0_i32_0 : i32, i32
  }
  func.func @transform_3(%arg0: i32) -> (i32, i32) {
    %c0_i32 = arith.constant 0 : i32
    %c0_i32_0 = arith.constant 0 : i32
    %c0_i32_1 = arith.constant 0 : i32
    return %c0_i32, %c0_i32_0 : i32, i32
  }
  func.func @transform_4(%arg0: i32) -> (i32, i32) {
    %c0_i32 = arith.constant 0 : i32
    %c0_i32_0 = arith.constant 0 : i32
    %c0_i32_1 = arith.constant 0 : i32
    return %c0_i32, %c0_i32_0 : i32, i32
  }
  func.func @transform_5(%arg0: i32) -> (i32, i32) {
    %c0_i32 = arith.constant 0 : i32
    %c0_i32_0 = arith.constant 0 : i32
    %c0_i32_1 = arith.constant 0 : i32
    return %c0_i32, %c0_i32_0 : i32, i32
  }
  func.func @transform_6(%arg0: i32) -> (i32, i32) {
    %c0_i32 = arith.constant 0 : i32
    %c0_i32_0 = arith.constant 0 : i32
    %c0_i32_1 = arith.constant 0 : i32
    return %c0_i32, %c0_i32_0 : i32, i32
  }
  func.func @transform_7(%arg0: i32) -> (i32, i32) {
    %c0_i32 = arith.constant 0 : i32
    %c0_i32_0 = arith.constant 0 : i32
    %c0_i32_1 = arith.constant 0 : i32
    return %c0_i32, %c0_i32_0 : i32, i32
  }
  func.func @transform_8(%arg0: i32) -> (i32, i32) {
    %c0_i32 = arith.constant 0 : i32
    %c0_i32_0 = arith.constant 0 : i32
    %c0_i32_1 = arith.constant 0 : i32
    return %c0_i32, %c0_i32_0 : i32, i32
  }
  func.func @transform_9(%arg0: i32) -> (i32, i32) {
    %c0_i32 = arith.constant 0 : i32
    %c0_i32_0 = arith.constant 0 : i32
    %c0_i32_1 = arith.constant 0 : i32
    return %c0_i32, %c0_i32_0 : i32, i32
  }
  func.func @transform_10(%arg0: i32) -> (i32, i32) {
    %c0_i32 = arith.constant 0 : i32
    %c0_i32_0 = arith.constant 0 : i32
    %c0_i32_1 = arith.constant 0 : i32
    return %c0_i32, %c0_i32_0 : i32, i32
  }
  func.func @transform_11(%arg0: i32) -> (i32, i32) {
    %c0_i32 = arith.constant 0 : i32
    %c0_i32_0 = arith.constant 0 : i32
    %c0_i32_1 = arith.constant 0 : i32
    return %c0_i32, %c0_i32_0 : i32, i32
  }
  func.func @transform_12(%arg0: i32) -> (i32, i32) {
    %c0_i32 = arith.constant 0 : i32
    %c0_i32_0 = arith.constant 0 : i32
    %c0_i32_1 = arith.constant 0 : i32
    return %c0_i32, %c0_i32_0 : i32, i32
  }
  func.func @transform_13(%arg0: i32) -> (i32, i32) {
    %c0_i32 = arith.constant 0 : i32
    %c0_i32_0 = arith.constant 0 : i32
    %c0_i32_1 = arith.constant 0 : i32
    return %c0_i32, %c0_i32_0 : i32, i32
  }
  func.func @transform_14(%arg0: i32) -> (i32, i32) {
    %c0_i32 = arith.constant 0 : i32
    %c0_i32_0 = arith.constant 0 : i32
    %c0_i32_1 = arith.constant 0 : i32
    return %c0_i32, %c0_i32_0 : i32, i32
  }
  func.func @transform_15(%arg0: i32) -> (i32, i32) {
    %c0_i32 = arith.constant 0 : i32
    %c0_i32_0 = arith.constant 0 : i32
    %c0_i32_1 = arith.constant 0 : i32
    return %c0_i32, %c0_i32_0 : i32, i32
  }
  func.func @transform_16(%arg0: i32) -> (i32, i32) {
    %c0_i32 = arith.constant 0 : i32
    %c0_i32_0 = arith.constant 0 : i32
    %c0_i32_1 = arith.constant 0 : i32
    return %c0_i32, %c0_i32_0 : i32, i32
  }
  func.func @transform_17(%arg0: i32) -> (i32, i32) {
    %c0_i32 = arith.constant 0 : i32
    %c0_i32_0 = arith.constant 0 : i32
    %c0_i32_1 = arith.constant 0 : i32
    return %c0_i32, %c0_i32_0 : i32, i32
  }
  func.func @transform_18(%arg0: i32) -> (i32, i32) {
    %c0_i32 = arith.constant 0 : i32
    %c0_i32_0 = arith.constant 0 : i32
    return %arg0, %c0_i32 : i32, i32
  }
}

</mosaic_0001>

<bundles_post_ra>
// kernel: protein_mpnn_dec_layer.1
= control target key start
LH: loop header
LB: loop body
LE: loop exit
PB: predicated region body
PF: predicated region fallthrough
CT: control target
= control target key end

     0   :  { %s1631_s0 = inlined_call_operand.vmem [shape: f32[16,37], index: 0, kind: input, shape index: {}]   ;;  %s1632_s1 = inlined_call_operand.vmem [shape: bf16[16,256], index: 1, kind: input, shape index: {}]   ;;  %s1633_s2 = inlined_call_operand.vmem [shape: bf16[32,128], index: 2, kind: input, shape index: {}]   ;;  %s1634_s3 = inlined_call_operand.vmem [shape: bf16[256,128], index: 3, kind: input, shape index: {}]   ;;  %s1635_s4 = inlined_call_operand.vmem [shape: f32[1,128], index: 4, kind: input, shape index: {}]   ;;  %s1636_s5 = inlined_call_operand.vmem [shape: bf16[128,128], index: 5, kind: input, shape index: {}]   ;;  %s1637_s6 = inlined_call_operand.vmem [shape: f32[1,128], index: 6, kind: input, shape index: {}]   ;;  %s1638_s7 = inlined_call_operand.vmem [shape: bf16[128,32], index: 7, kind: input, shape index: {}]   ;;  %s1639_s8 = inlined_call_operand.vmem [shape: f32[1,32], index: 8, kind: input, shape index: {}]   ;;  %s1640_s9 = inlined_call_operand.vmem [shape: bf16[4,128], index: 9, kind: input, shape index: {}]   ;;  %s1641_s10 = inlined_call_operand.vmem [shape: f32[1,32], index: 10, kind: input, shape index: {}]   ;;  %s1642_s11 = inlined_call_operand.vmem [shape: f32[1,32], index: 11, kind: input, shape index: {}]   ;;  %s1643_s12 = inlined_call_operand.vmem [shape: bf16[32,128], index: 12, kind: input, shape index: {}]   ;;  %s1644_s13 = inlined_call_operand.vmem [shape: f32[1,128], index: 13, kind: input, shape index: {}]   ;;  %s1645_s14 = inlined_call_operand.vmem [shape: bf16[128,32], index: 14, kind: input, shape index: {}]   ;;  %s1646_s15 = inlined_call_operand.vmem [shape: f32[1,32], index: 15, kind: input, shape index: {}]   ;;  %s1647_s16 = inlined_call_operand.vmem [shape: f32[1,32], index: 16, kind: input, shape index: {}]   ;;  %s1648_s17 = inlined_call_operand.vmem [shape: f32[1,32], index: 17, kind: input, shape index: {}]   ;;  %s1649_s18 = inlined_call_operand.hbm [shape: f32[16,32], index: 18, kind: output, shape index: {}]  }
   0x1   :  { %1653 = sst [smem:[#allocation5_spill]] %s1631_s0 }
   0x2   :  { %1654 = sst [smem:[#allocation6_spill]] %s1632_s1 }
   0x3   :  { %1655 = sst [smem:[#allocation7_spill]] %s1633_s2 }
   0x4   :  { %v1176_v0 = vld [vmem:[%s1634_s3 + $0x40] sm:$0xff]   ;;  %v1267_v2 = vmov 0.0   ;;  %v1178_v3 = vld [vmem:[%s1634_s3 + $0x48] sm:$0xff]   ;;  %vm1268_vm0 = vmmov 0   ;;  %v1180_v5 = vld [vmem:[%s1634_s3 + $0x50] sm:$0xff]   ;;  %s1656_s19 = sld [smem:[#allocation7_spill]] }
   0x5   :  { %v1177_v1 = vld [vmem:[%s1634_s3] sm:$0xff]   ;;  %1085 = vmatprep.subr.bf16.mxu1 %v1267_v2  ;;  %1028 = vmatprep.subr.bf16.mxu0 %v1176_v0  ;;  %v1179_v4 = vld [vmem:[%s1634_s3 + $0x8] sm:$0xff]   ;;  %v1181_v6 = vld [vmem:[%s1634_s3 + $0x10] sm:$0xff]   ;;  %s1657_s30 = sld [smem:[#allocation6_spill]]  ;;  %s1658_s20 = sld [smem:[#allocation5_spill]]  ;;  %vm261_vm1 = vcmask 261120  }
   0x6   :  { %1089 = vmatprep.mubr.msk.bf16.mxu1 %vm1268_vm0, %v1267_v2  ;;  %1029 = vmatpush3.bf16.msra.mxu0 %v1177_v1  ;;  %v1182_v7 = vld [vmem:[%s1634_s3 + $0x58] sm:$0xff]   ;;  %v1184_v9 = vld [vmem:[%s1634_s3 + $0x60] sm:$0xff]   ;;  %v1186_v12 = vld [vmem:[%s1634_s3 + $0x68] sm:$0xff]   ;;  %s1269_s25 = smov 96  }
   0x7   :  { %1030 = vmatprep.subr.bf16.mxu0 %v1178_v3  ;;  %v1183_v8 = vld [vmem:[%s1634_s3 + $0x18] sm:$0xff]   ;;  %v1185_v11 = vld [vmem:[%s1634_s3 + $0x20] sm:$0xff]   ;;  %v1187_v13 = vld [vmem:[%s1634_s3 + $0x28] sm:$0xff]  }
   0x8   :  { %v1188_v15 = vld [vmem:[%s1634_s3 + $0x70] sm:$0xff]   ;;  %v1191_v21 = vld [vmem:[%s1634_s3 + $0x78] sm:$0xff]  }
   0x9   :  { %v1189_v20 = vld [vmem:[%s1634_s3 + $0x30] sm:$0xff]   ;;  %v1192_v22 = vld [vmem:[%s1634_s3 + $0x38] sm:$0xff]  }
   0xa   :  { %1031 = vmatpush3.bf16.msra.mxu0 %v1179_v4  ;;  %v1190_v10 = vld [vmem:[%s1656_s19] sm:$0xff]   ;;  %v1193_v14 = vld [vmem:[%s1656_s19 + $0x8] sm:$0xff]  }
   0xb   :  { %1032 = vmatprep.subr.bf16.mxu0 %v1180_v5  ;;  %1086 = vmatpush3.bf16.msra.mxu1 %v1190_v10  ;;  %v1196_v16 = vld [vmem:[%s1657_s30 + $0x4] ss:$8 sps:$4 sm:$0xff]   ;;  %v1194_v23 = vld [vmem:[%s1657_s30] ss:$8 sps:$4 sm:$0xff]  }
   0xc   :  { %1087 = vmatprep.subr.bf16.mxu1 %v1267_v2  ;;  %v1424_v17 = vld [vmem:[%s1658_s20] sm:$0xff]  ;;  %v1429_v18 = vld [vmem:[%s1658_s20 + $0x8] sm:$0xff]  ;;  %240 = vmatprep.mubr.bf16.mxu0 %v1196_v16 }
   0xd   :  { %v63_v19 = vpack.c.bf16 %v1429_v18, %v1424_v17  ;;  %540 = vrot.lane.b32.xlu1 %v1429_v18, %s1269_s25 }
   0xe   :  { %1033 = vmatpush3.bf16.msra.mxu0 %v1181_v6 }
   0xf   :  { %1034 = vmatprep.subr.bf16.mxu0 %v1182_v7  ;;  %1088 = vmatpush3.bf16.msra.mxu1 %v1193_v14 }
  0x10   :  { %1093 = vmatprep.subr.bf16.mxu1 %v1267_v2  ;;  %466 = vrot.lane.b32.xlu0 %v63_v19, %s1269_s25 }
  0x12   :  { %1035 = vmatpush3.bf16.msra.mxu0 %v1183_v8  ;;  %1090 = vmatmul.mubr.msk.bf16.vlgmr.msra.gmra.mrb[0].mxu1 %vm261_vm1, %v63_v19 }
  0x13   :  { %1036 = vmatprep.subr.bf16.mxu0 %v1184_v9  ;;  %1109 = vmatprep.mubr.msk.bf16.mxu1 %vm1268_vm0, %v1267_v2 }
  0x14   :  { %538 = vrot.lane.b32.xlu0 %v1424_v17, %s1269_s25 }
  0x16   :  { %1037 = vmatpush3.bf16.msra.mxu0 %v1185_v11 }
  0x17   :  { %1038 = vmatprep.subr.bf16.mxu0 %v1186_v12 }
  0x1a   :  { %1039 = vmatpush3.bf16.msra.mxu0 %v1187_v13 }
  0x1b   :  { %1040 = vmatprep.subr.bf16.mxu0 %v1188_v15 }
  0x1e   :  { %1041 = vmatpush3.bf16.msra.mxu0 %v1189_v20 }
  0x1f   :  { %1042 = vmatprep.subr.bf16.mxu0 %v1191_v21 }
  0x22   :  { %1043 = vmatpush3.bf16.msra.mxu0 %v1192_v22 }
  0x23   :  { %1113 = vmatprep.subr.bf16.mxu0 %v1267_v2 }
  0x25   :  { %241 = vmatmul.mubr.bf16.vlgmr.msra.gmra.mrb[0].mxu0 %v1194_v23 }
  0x26   :  { %1115 = vmatprep.mubr.msk.bf16.mxu0 %vm1268_vm0, %v1267_v2 }
  0x27   :  { %23 = vsyncpa [#allocation3], 0  ;;  %v1197_v24 = vld [vmem:[%s1636_s5] sm:$0xff]   ;;  %v1198_v25 = vld [vmem:[%s1636_s5 + $0x8] sm:$0xff]   ;;  %vm472_vm2 = vcmask 1041408   ;;  %vm468_vm3 = vcmask 31744  }
  0x28   :  { %1094 = vmatpush3.bf16.msra.mxu1 %v1197_v24  ;;  %v1199_v26 = vld [vmem:[%s1636_s5 + $0x10] sm:$0xff]   ;;  %v1200_v27 = vld [vmem:[%s1636_s5 + $0x18] sm:$0xff]   ;;  %v1201_v28 = vld [vmem:[%s1636_s5 + $0x20] sm:$0xff]   ;;  %s1271_s20 = smov [#allocation2]  }
  0x29   :  { %1095 = vmatprep.subr.bf16.mxu1 %v1267_v2  ;;  %v1202_v29 = vld [vmem:[%s1636_s5 + $0x28] sm:$0xff]   ;;  %v1203_v30 = vld [vmem:[%s1636_s5 + $0x30] sm:$0xff]   ;;  %v1204_v31 = vld [vmem:[%s1636_s5 + $0x38] sm:$0xff]   ;;  %s959_s30 = sshll.u32 %s1271_s20, 4  ;;  %s960_s30 = int_to_ptr.vmem [resolvable:$true] %s959_s30 }
  0x2a   :  { %v464_v32 = vld [vmem:[%s1640_s9] sm:$0x3]  ;;  %v1206_v7 = vld [vmem:[%s1638_s7 + $0x8] sm:$0xff]   ;;  %v1207_v8 = vld [vmem:[%s1638_s7 + $0x10] sm:$0xff]   ;;  %p1248_p1 = scmp.lt.s32.totalorder %s960_s30, %s960_s30 }
  0x2b   :  { %v474_v33 = vsel %vm472_vm2, %v464_v32, 0  ;;  %v991_v43 = vld [vmem:[%s1635_s4] ss:$0 sm:$0xff]  ;;  %v1208_v9 = vld [vmem:[%s1638_s7 + $0x18] sm:$0xff]   ;;  %v1210_v11 = vld [vmem:[%s1638_s7 + $0x28] sm:$0xff]  }
  0x2c   :  { %1096 = vmatpush3.bf16.msra.mxu1 %v1198_v25  ;;  %1114 = vmatpush3.bf16.msra.mxu0 %v474_v33  ;;  %v1205_v6 = vld [vmem:[%s1638_s7] sm:$0xff]   ;;  %v1211_v14 = vld [vmem:[%s1638_s7 + $0x30] sm:$0xff]   ;;  %v1212_v19 = vld [vmem:[%s1638_s7 + $0x38] sm:$0xff]  }
  0x2d   :  { %1097 = vmatprep.subr.bf16.mxu1 %v1267_v2  ;;  %1119 = vmatprep.subr.bf16.mxu0 %v1267_v2  ;;  %v1209_v10 = vld [vmem:[%s1638_s7 + $0x20] sm:$0xff]  }
  0x2e   :  { %v992_v24 = vld [vmem:[%s1637_s6] ss:$0 sm:$0xff] }
  0x30   :  { %1098 = vmatpush3.bf16.msra.mxu1 %v1199_v26 }
  0x31   :  { %1099 = vmatprep.subr.bf16.mxu1 %v1267_v2 }
  0x34   :  { %1100 = vmatpush3.bf16.msra.mxu1 %v1200_v27 }
  0x35   :  { %1101 = vmatprep.subr.bf16.mxu1 %v1267_v2 }
  0x38   :  { %1102 = vmatpush3.bf16.msra.mxu1 %v1201_v28 }
  0x39   :  { %1103 = vmatprep.subr.bf16.mxu1 %v1267_v2 }
  0x3c   :  { %1104 = vmatpush3.bf16.msra.mxu1 %v1202_v29 }
  0x3d   :  { %1105 = vmatprep.subr.bf16.mxu1 %v1267_v2 }
  0x40   :  { %1106 = vmatpush3.bf16.msra.mxu1 %v1203_v30 }
  0x41   :  { %1107 = vmatprep.subr.bf16.mxu1 %v1267_v2 }
  0x44   :  { %1108 = vmatpush3.bf16.msra.mxu1 %v1204_v31 }
  0x45   :  { %1139 = vmatprep.subr.bf16.mxu1 %v1267_v2 }
  0x7f   :  { %v541_v21 = vpop.permute.xlu1 %540 }
  0x80   :  { %v547_v23 = vsel %vm468_vm3, %v541_v21, 0.0 }
  0x81   :  { %548 = vadd.xlane.f32.xlu0 %v547_v23 }
  0x82   :  { %v467_v34 = vpop.permute.xlu0 %466 }
  0x83   :  { %1116 = vmatmul.mubr.msk.bf16.vlgmr.msra.gmra.mrb[4].mxu0 %vm468_vm3, %v467_v34 }
  0x84   :  { %1135 = vmatprep.mubr.msk.bf16.mxu0 %vm1268_vm0, %v1267_v2  ;;  %1120 = vmatpush3.bf16.msra.mxu0 %v1205_v6 }
  0x85   :  { %1121 = vmatprep.subr.bf16.mxu0 %v1267_v2 }
  0x86   :  { %v539_v20 = vpop.permute.xlu0 %538 }
  0x87   :  { %v544_v22 = vsel %vm468_vm3, %v539_v20, 0.0 }
  0x88   :  { %1122 = vmatpush3.bf16.msra.mxu0 %v1206_v7  ;;  %545 = vadd.xlane.f32.xlu1 %v544_v22 }
  0x89   :  { %1123 = vmatprep.subr.bf16.mxu0 %v1267_v2 }
  0x8c   :  { %1124 = vmatpush3.bf16.msra.mxu0 %v1207_v8 }
  0x8d   :  { %1125 = vmatprep.subr.bf16.mxu0 %v1267_v2 }
  0x90   :  { %1126 = vmatpush3.bf16.msra.mxu0 %v1208_v9 }
  0x91   :  { %1127 = vmatprep.subr.bf16.mxu0 %v1267_v2 }
  0x94   :  { %1128 = vmatpush3.bf16.msra.mxu0 %v1209_v10 }
  0x95   :  { %1129 = vmatprep.subr.bf16.mxu0 %v1267_v2 }
  0x98   :  { %1130 = vmatpush3.bf16.msra.mxu0 %v1210_v11 }
  0x99   :  { %1131 = vmatprep.subr.bf16.mxu0 %v1267_v2 }
  0x9c   :  { %1132 = vmatpush3.bf16.msra.mxu0 %v1211_v14 }
  0x9d   :  { %1133 = vmatprep.subr.bf16.mxu0 %v1267_v2 }
  0xa0   :  { %1134 = vmatpush3.bf16.msra.mxu0 %v1212_v19  ;;  %v1214_v19 = vld [vmem:[%s1643_s12 + $0x8] sm:$0xff]  }
  0xe5   :  { %v299_v35 = vpop.f32.mrb[0].mxu1 }
  0xe6   :  { %v1091_v36 = vpop.f32.mrb[1].mxu1 }
  0xe7   :  { %v302_v37 = vpop.f32.mrb[2].mxu1 }
  0xe8   :  { %v1092_v38 = vpop.f32.mrb[3].mxu1 }
  0xf8   :  { %v1044_v39 = vpop.f32.mrb[0].mxu0 }
  0xf9   :  { %v1045_v40 = vpop.f32.mrb[1].mxu0 }
  0xfa   :  { %v1046_v41 = vadd.f32 %v1045_v40, %v1044_v39  ;;  %v1047_v42 = vpop.f32.mrb[2].mxu0 }
  0xfb   :  { %v1048_v44 = vpop.f32.mrb[3].mxu0 }
  0xfc   :  { %v300_v45 = vadd.f32 %v1046_v41, %v299_v35  ;;  %v1049_v46 = vadd.f32 %v1048_v44, %v1047_v42 }
  0xfe   :  { %v313_v47 = vadd.f32 %v991_v43, %v300_v45  ;;  %v303_v48 = vadd.f32 %v1049_v46, %v302_v37 }
 0x100   :  { %v317_v49 = vmul.f32 0.044715, %v313_v47  ;;  %v314_v50 = vadd.f32 %v991_v43, %v303_v48  ;;  %v315_v63 = vmul.f32 0.5, %v313_v47 }
 0x102   :  { %v319_v51 = vmul.f32 %v317_v49, %v313_v47  ;;  %v318_v52 = vmul.f32 0.044715, %v314_v50  ;;  %v316_v0 = vmul.f32 0.5, %v314_v50 }
 0x104   :  { %v321_v53 = vmul.f32 %v319_v51, %v313_v47  ;;  %v320_v54 = vmul.f32 %v318_v52, %v314_v50  ;;  %v1002_v52 = vld [vmem:[%s1639_s8] ss:$0 sm:$0xff] }
 0x106   :  { %v322_v55 = vmul.f32 %v320_v54, %v314_v50  ;;  %v323_v56 = vadd.f32 %v321_v53, %v313_v47 }
 0x108   :  { %v324_v57 = vadd.f32 %v322_v55, %v314_v50  ;;  %v325_v58 = vmul.f32 0.7978846, %v323_v56 }
 0x10a   :  { %v326_v59 = vmul.f32 0.7978846, %v324_v57  ;;  %1223 = vtanh.f32 %v325_v58 }
 0x10c   :  { %1225 = vtanh.f32 %v326_v59 }
 0x10e   :  { %v549_v54 = vpop.xlane.xlu0 %548 }
 0x10f   :  { %v558_v56 = vmul.f32 %v1002_v52, %v549_v54 }
 0x114   :  { %v1224_v60 = vpop.eup %1223 }
 0x115   :  { %v329_v61 = vadd.f32 1.0, %v1224_v60  ;;  %v546_v53 = vpop.xlane.xlu1 %545 }
 0x116   :  { %v1226_v62 = vpop.eup %1225  ;;  %v557_v55 = vmul.f32 %v1002_v52, %v546_v53 }
 0x117   :  { %v330_v1 = vadd.f32 1.0, %v1226_v62  ;;  %v331_v3 = vmul.f32 %v329_v61, %v315_v63 }
 0x119   :  { %v332_v4 = vmul.f32 %v330_v1, %v316_v0 }
 0x11b   :  { %v333_v5 = vpack.c.bf16 %v332_v4, %v331_v3 }
 0x11d   :  { %1110 = vmatmul.mubr.bf16.vlgmr.msra.gmra.mrb[4].mxu1 %v333_v5 }
 0x11e   :  { %1143 = vmatprep.mubr.msk.bf16.mxu1 %vm1268_vm0, %v1267_v2 }
 0x156   :  { %v510_v12 = vpop.f32.mrb[4].mxu0 }
 0x157   :  { %v1117_v13 = vpop.f32.mrb[5].mxu0 }
 0x158   :  { %v513_v15 = vpop.f32.mrb[6].mxu0 }
 0x159   :  { %v1118_v16 = vpop.f32.mrb[7].mxu0 }
 0x15a   :  { %v1213_v16 = vld [vmem:[%s1643_s12] sm:$0xff]  }
 0x15b   :  { %1140 = vmatpush3.bf16.msra.mxu1 %v1213_v16 }
 0x15c   :  { %1141 = vmatprep.subr.bf16.mxu1 %v1267_v2 }
 0x15f   :  { %1142 = vmatpush3.bf16.msra.mxu1 %v1214_v19 }
 0x160   :  { %1147 = vmatprep.subr.bf16.mxu1 %v1267_v2 }
 0x1f0   :  { %v439_v25 = vpop.f32.mrb[4].mxu1 }
 0x1f1   :  { %v440_v26 = vadd.f32 %v992_v24, %v439_v25  ;;  %v1111_v27 = vpop.f32.mrb[5].mxu1 }
 0x1f2   :  { %v442_v28 = vpop.f32.mrb[6].mxu1  ;;  %v1011_v27 = vld [vmem:[%s1641_s10] ss:$0 sm:$0xff] }
 0x1f3   :  { %v448_v29 = vmul.f32 0.044715, %v440_v26  ;;  %v443_v30 = vadd.f32 %v992_v24, %v442_v28  ;;  %v1112_v31 = vpop.f32.mrb[7].mxu1  ;;  %v446_v42 = vmul.f32 0.5, %v440_v26 }
 0x1f5   :  { %v449_v32 = vmul.f32 0.044715, %v443_v30  ;;  %v450_v33 = vmul.f32 %v448_v29, %v440_v26  ;;  %v447_v46 = vmul.f32 0.5, %v443_v30 }
 0x1f7   :  { %v452_v34 = vmul.f32 %v450_v33, %v440_v26  ;;  %v451_v35 = vmul.f32 %v449_v32, %v443_v30  ;;  %v1012_v32 = vld [vmem:[%s1642_s11] ss:$0 sm:$0xff] }
 0x1f9   :  { %v454_v36 = vadd.f32 %v452_v34, %v440_v26  ;;  %v453_v37 = vmul.f32 %v451_v35, %v443_v30 }
 0x1fb   :  { %v456_v38 = vmul.f32 0.7978846, %v454_v36  ;;  %v455_v39 = vadd.f32 %v453_v37, %v443_v30  ;;  %v1215_v37 = vld [vmem:[%s1645_s14] sm:$0xff]  }
 0x1fd   :  { %1227 = vtanh.f32 %v456_v38  ;;  %v457_v40 = vmul.f32 0.7978846, %v455_v39  ;;  %v1216_v38 = vld [vmem:[%s1645_s14 + $0x8] sm:$0xff]   ;;  %v1217_v39 = vld [vmem:[%s1645_s14 + $0x10] sm:$0xff]  }
 0x1ff   :  { %1229 = vtanh.f32 %v457_v40  ;;  %v1218_v40 = vld [vmem:[%s1645_s14 + $0x18] sm:$0xff]  }
 0x207   :  { %v1228_v41 = vpop.eup %1227 }
 0x208   :  { %v460_v43 = vadd.f32 1.0, %v1228_v41  ;;  %v1219_v41 = vld [vmem:[%s1645_s14 + $0x20] sm:$0xff]  }
 0x209   :  { %v1230_v44 = vpop.eup %1229 }
 0x20a   :  { %v462_v45 = vmul.f32 %v460_v43, %v446_v42  ;;  %v461_v47 = vadd.f32 1.0, %v1230_v44  ;;  %v1220_v42 = vld [vmem:[%s1645_s14 + $0x28] sm:$0xff]   ;;  %v1221_v43 = vld [vmem:[%s1645_s14 + $0x30] sm:$0xff]   ;;  %v1222_v44 = vld [vmem:[%s1645_s14 + $0x38] sm:$0xff]  }
 0x20c   :  { %v517_v48 = vmul.f32 %v510_v12, %v462_v45  ;;  %v463_v49 = vmul.f32 %v461_v47, %v447_v46  ;;  %v1013_v45 = vld [vmem:[%s1644_s13] ss:$0 sm:$0xff] }
 0x20e   :  { %v518_v50 = vmul.f32 %v513_v15, %v463_v49 }
 0x210   :  { %v519_v51 = vpack.c.bf16 %v518_v50, %v517_v48 }
 0x212   :  { %1136 = vmatmul.mubr.bf16.vlgmr.msra.gmra.mrb[8].mxu0 %v519_v51 }
 0x2e5   :  { %v641_v57 = vpop.f32.mrb[8].mxu0 }
 0x2e6   :  { %v642_v58 = vadd.f32 %v641_v57, %v557_v55  ;;  %v1137_v59 = vpop.f32.mrb[9].mxu0 }
 0x2e7   :  { %v644_v60 = vpop.f32.mrb[10].mxu0 }
 0x2e8   :  { %v648_v61 = vmul.f32 0.033333335, %v642_v58  ;;  %v645_v62 = vadd.f32 %v644_v60, %v558_v56  ;;  %v1138_v63 = vpop.f32.mrb[11].mxu0 }
 0x2ea   :  { %v649_v0 = vmul.f32 0.033333335, %v645_v62  ;;  %v650_v1 = vadd.f32 %v648_v61, %v1424_v17 }
 0x2ec   :  { %v654_v3 = vsel %vm261_vm1, %v650_v1, 0.0  ;;  %v651_v4 = vadd.f32 %v649_v0, %v1429_v18 }
 0x2ed   :  { %655 = vadd.xlane.f32.xlu0 %v654_v3 }
 0x2ee   :  { %v657_v5 = vsel %vm261_vm1, %v651_v4, 0.0 }
 0x2ef   :  { %658 = vadd.xlane.f32.xlu1 %v657_v5 }
 0x37a   :  { %v656_v6 = vpop.xlane.xlu0 %655 }
 0x37b   :  { %v661_v7 = vmul.f32 0.03125, %v656_v6 }
 0x37c   :  { %v659_v8 = vpop.xlane.xlu1 %658 }
 0x37d   :  { %v663_v9 = vsub.f32 %v650_v1, %v661_v7  ;;  %v662_v10 = vmul.f32 0.03125, %v659_v8  ;;  %v1017_v7 = vld [vmem:[%s1646_s15] ss:$0 sm:$0xff] }
 0x37f   :  { %v664_v11 = vsub.f32 %v651_v4, %v662_v10  ;;  %v665_v12 = vmul.f32 %v663_v9, %v663_v9 }
 0x381   :  { %v667_v13 = vsel %vm261_vm1, %v665_v12, 0.0  ;;  %v666_v14 = vmul.f32 %v664_v11, %v664_v11 }
 0x382   :  { %668 = vadd.xlane.f32.xlu0 %v667_v13 }
 0x383   :  { %v670_v15 = vsel %vm261_vm1, %v666_v14, 0.0 }
 0x384   :  { %671 = vadd.xlane.f32.xlu1 %v670_v15 }
 0x40f   :  { %v669_v20 = vpop.xlane.xlu0 %668 }
 0x410   :  { %v673_v21 = vmul.f32 0.03125, %v669_v20  ;;  %v1270_v20 = vmov 36  }
 0x411   :  { %v672_v22 = vpop.xlane.xlu1 %671  ;;  %1174 = vset.pattern.permute.xlu0 %v1270_v20  ;;  %1175 = vset.pattern.permute.xlu1 %v1270_v20 }
 0x412   :  { %v675_v23 = vadd.f32 1e-05, %v673_v21  ;;  %v674_v24 = vmul.f32 0.03125, %v672_v22 }
 0x414   :  { %1231 = vrsqrt.f32 %v675_v23  ;;  %v676_v25 = vadd.f32 1e-05, %v674_v24 }
 0x416   :  { %1233 = vrsqrt.f32 %v676_v25 }
 0x41e   :  { %v1232_v26 = vpop.eup %1231 }
 0x41f   :  { %v679_v28 = vmul.f32 %v1232_v26, %v663_v9 }
 0x420   :  { %v1234_v29 = vpop.eup %1233 }
 0x421   :  { %v687_v30 = vmul.f32 %v1011_v27, %v679_v28  ;;  %v680_v31 = vmul.f32 %v1234_v29, %v664_v11 }
 0x423   :  { %v688_v33 = vmul.f32 %v1011_v27, %v680_v31  ;;  %v1557_v34 = vadd.f32 %v1012_v32, %v687_v30 }
 0x425   :  { %v1559_v35 = vadd.f32 %v1012_v32, %v688_v33 }
 0x427   :  { %v697_v36 = vpack.c.bf16 %v1559_v35, %v1557_v34 }
 0x429   :  { %1144 = vmatmul.mubr.msk.bf16.vlgmr.msra.gmra.mrb[8].mxu1 %vm261_vm1, %v697_v36 }
 0x42a   :  { %1163 = vmatprep.mubr.msk.bf16.mxu1 %vm1268_vm0, %v1267_v2  ;;  %1148 = vmatpush3.bf16.msra.mxu1 %v1215_v37 }
 0x42b   :  { %1149 = vmatprep.subr.bf16.mxu1 %v1267_v2 }
 0x42e   :  { %1150 = vmatpush3.bf16.msra.mxu1 %v1216_v38  ;;  %v1026_v38 = vld [vmem:[%s1647_s16] ss:$0 sm:$0xff]  ;;  %s1243_s16 = scalar_lea.vmem %s960_s30, 256 }
 0x42f   :  { %1151 = vmatprep.subr.bf16.mxu1 %v1267_v2  ;;  %p1244_p0 = scmp.ne.s32.totalorder %s960_s30, %s1243_s16  ;;  %p1249_p2 = scmp.lt.s32.totalorder %s1243_s16, %s1243_s16 }
 0x431   :  { %p1250_p3 = por %p1249_p2, %p1248_p1 }
 0x432   :  { %1152 = vmatpush3.bf16.msra.mxu1 %v1217_v39 }
 0x433   :  { %1153 = vmatprep.subr.bf16.mxu1 %v1267_v2  ;;  %p1251_p4 = pnand %p1250_p3, %p1244_p0 }
 0x436   :  { %1154 = vmatpush3.bf16.msra.mxu1 %v1218_v40 }
 0x437   :  { %1155 = vmatprep.subr.bf16.mxu1 %v1267_v2 }
 0x43a   :  { %1156 = vmatpush3.bf16.msra.mxu1 %v1219_v41 }
 0x43b   :  { %1157 = vmatprep.subr.bf16.mxu1 %v1267_v2 }
 0x43e   :  { %1158 = vmatpush3.bf16.msra.mxu1 %v1220_v42 }
 0x43f   :  { %1159 = vmatprep.subr.bf16.mxu1 %v1267_v2 }
 0x442   :  { %1160 = vmatpush3.bf16.msra.mxu1 %v1221_v43 }
 0x443   :  { %1161 = vmatprep.subr.bf16.mxu1 %v1267_v2 }
 0x446   :  { %1162 = vmatpush3.bf16.msra.mxu1 %v1222_v44 }
 0x4fc   :  { %v758_v46 = vpop.f32.mrb[8].mxu1 }
 0x4fd   :  { %v759_v47 = vadd.f32 %v1013_v45, %v758_v46  ;;  %v1145_v48 = vpop.f32.mrb[9].mxu1 }
 0x4fe   :  { %v761_v49 = vpop.f32.mrb[10].mxu1 }
 0x4ff   :  { %v767_v50 = vmul.f32 0.044715, %v759_v47  ;;  %v762_v51 = vadd.f32 %v1013_v45, %v761_v49  ;;  %v1146_v52 = vpop.f32.mrb[11].mxu1  ;;  %v765_v0 = vmul.f32 0.5, %v759_v47 }
 0x501   :  { %v769_v53 = vmul.f32 %v767_v50, %v759_v47  ;;  %v768_v54 = vmul.f32 0.044715, %v762_v51  ;;  %v766_v1 = vmul.f32 0.5, %v762_v51 }
 0x503   :  { %v771_v55 = vmul.f32 %v769_v53, %v759_v47  ;;  %v770_v56 = vmul.f32 %v768_v54, %v762_v51 }
 0x505   :  { %v773_v57 = vadd.f32 %v771_v55, %v759_v47  ;;  %v772_v58 = vmul.f32 %v770_v56, %v762_v51 }
 0x507   :  { %v775_v59 = vmul.f32 0.7978846, %v773_v57  ;;  %v774_v2 = vadd.f32 %v772_v58, %v762_v51 }
 0x509   :  { %1235 = vtanh.f32 %v775_v59  ;;  %v776_v60 = vmul.f32 0.7978846, %v774_v2 }
 0x50b   :  { %1237 = vtanh.f32 %v776_v60 }
 0x513   :  { %v1236_v61 = vpop.eup %1235 }
 0x514   :  { %v779_v62 = vadd.f32 1.0, %v1236_v61 }
 0x515   :  { %v1238_v63 = vpop.eup %1237 }
 0x516   :  { %v780_v3 = vadd.f32 1.0, %v1238_v63  ;;  %v781_v4 = vmul.f32 %v779_v62, %v765_v0 }
 0x518   :  { %v782_v5 = vmul.f32 %v780_v3, %v766_v1 }
 0x51a   :  { %v783_v6 = vpack.c.bf16 %v782_v5, %v781_v4 }
 0x51c   :  { %1164 = vmatmul.mubr.bf16.vlgmr.msra.gmra.mrb[12].mxu1 %v783_v6 }
 0x5ef   :  { %v889_v8 = vpop.f32.mrb[12].mxu1 }
 0x5f0   :  { %v890_v9 = vadd.f32 %v1017_v7, %v889_v8  ;;  %v1165_v10 = vpop.f32.mrb[13].mxu1 }
 0x5f1   :  { %v892_v11 = vpop.f32.mrb[14].mxu1 }
 0x5f2   :  { %v893_v12 = vadd.f32 %v1017_v7, %v892_v11  ;;  %v1166_v13 = vpop.f32.mrb[15].mxu1  ;;  %v896_v14 = vadd.f32 %v890_v9, %v1557_v34 }
 0x5f4   :  { %v900_v15 = vsel %vm261_vm1, %v896_v14, 0.0  ;;  %v897_v16 = vadd.f32 %v893_v12, %v1559_v35 }
 0x5f5   :  { %901 = vadd.xlane.f32.xlu0 %v900_v15 }
 0x5f6   :  { %v903_v19 = vsel %vm261_vm1, %v897_v16, 0.0 }
 0x5f7   :  { %904 = vadd.xlane.f32.xlu1 %v903_v19 }
 0x682   :  { %v902_v21 = vpop.xlane.xlu0 %901 }
 0x683   :  { %v906_v22 = vmul.f32 0.03125, %v902_v21 }
 0x684   :  { %v905_v23 = vpop.xlane.xlu1 %904 }
 0x685   :  { %v908_v24 = vsub.f32 %v896_v14, %v906_v22  ;;  %v907_v25 = vmul.f32 0.03125, %v905_v23 }
 0x687   :  { %v909_v26 = vsub.f32 %v897_v16, %v907_v25  ;;  %v910_v27 = vmul.f32 %v908_v24, %v908_v24 }
 0x689   :  { %v912_v28 = vsel %vm261_vm1, %v910_v27, 0.0  ;;  %v911_v29 = vmul.f32 %v909_v26, %v909_v26 }
 0x68a   :  { %913 = vadd.xlane.f32.xlu0 %v912_v28 }
 0x68b   :  { %v915_v30 = vsel %vm261_vm1, %v911_v29, 0.0 }
 0x68c   :  { %916 = vadd.xlane.f32.xlu1 %v915_v30 }
 0x69d   :  { %947 = vperm.xlu1 %1175, %v1429_v18   ;;  %v1027_v18 = vld [vmem:[%s1648_s17] ss:$0 sm:$0xff] }
 0x6a0   :  { %943 = vperm.xlu0 %1174, %v1424_v17  }
 0x717   :  { %v914_v31 = vpop.xlane.xlu0 %913 }
 0x718   :  { %v918_v32 = vmul.f32 0.03125, %v914_v31 }
 0x719   :  { %v917_v33 = vpop.xlane.xlu1 %916 }
 0x71a   :  { %v920_v34 = vadd.f32 1e-05, %v918_v32  ;;  %v919_v35 = vmul.f32 0.03125, %v917_v33 }
 0x71c   :  { %1239 = vrsqrt.f32 %v920_v34  ;;  %v921_v36 = vadd.f32 1e-05, %v919_v35 }
 0x71d   :  { %v948_v45 = vpop.permute.xlu1 %947 }
 0x71e   :  { %1241 = vrsqrt.f32 %v921_v36 }
 0x71f   :  { %v944_v42 = vpop.permute.xlu0 %943 }
 0x726   :  { %v1240_v37 = vpop.eup %1239 }
 0x727   :  { %v924_v39 = vmul.f32 %v1240_v37, %v908_v24 }
 0x728   :  { %v1242_v40 = vpop.eup %1241 }
 0x729   :  { %v932_v17 = vmul.f32 %v1026_v38, %v924_v39  ;;  %v925_v41 = vmul.f32 %v1242_v40, %v909_v26 }
 0x72b   :  { %v940_v43 = vadd.f32 %v1027_v18, %v932_v17  ;;  %v933_v44 = vmul.f32 %v1026_v38, %v925_v41 }
 0x72d   :  { %v950_v46 = vmul.f32 %v944_v42, %v940_v43  ;;  %v941_v47 = vadd.f32 %v1027_v18, %v933_v44 }
 0x72f   :  { %952 = vst.msk [vmem:[#allocation2] sm:$0xff] %vm261_vm1, %v950_v46  ;;  %v951_v48 = vmul.f32 %v948_v45, %v941_v47 }
 0x731   :  { %953 = vst.msk [vmem:[#allocation2 + $0x8] sm:$0xff] %vm261_vm1, %v951_v48 }
 0x732   :  { %1254 = shalt.err (!%p1251_p4)
}
 0x733   :  { %s1255_s21 = scalar_lea.hbm %s1649_s18, 256 }
 0x734   :  { %p1256_p5 = scmp.ne.s32.totalorder %s1649_s18, %s1255_s21  ;;  %p1259_p6 = scmp.lt.u32.totalorder %s1255_s21, %s1649_s18 }
 0x736   :  { %p1261_p7 = pnand %p1259_p6, %p1256_p5 }
 0x738   :  { %1264 = shalt.err (!%p1261_p7)
}
 0x739   :  { %s1272_s2 = smov 128   ;;  %s1273_s23 = smov 8  }
 0x73a   :  { %965 = dma.vmem_to_hbm [thread:$0]  %s960_s30, 256, %s1649_s18, [#allocation3], %s1272_s2, %s1272_s2, %s1273_s23  }
 0x73b   :  { %1265 = dma.done.wait [#allocation3], 256  }
 0x73c   :  { %1266 = vsyncadd [#allocation3], 4294967040 }
 0x73d   :  { %969 = vsyncpa [#allocation3], 1 }

</bundles_post_ra>
